<compile_context>
chip_gen: v5e
topology: v5e:2x2
jax: 0.10.0
libtpu: 0.0.40
codegen_flags: <defaults>
</compile_context>

<pallas_src>
import jax
import jax.numpy as jnp
from jax.experimental import pallas as pl
from jax.experimental.pallas import tpu as pltpu

EPS = 1e-5


def fc_net_kernel(x_ref, w1_ref, b1_ref, w2_ref, b2_ref, o_ref):
    # x_ref : (TM, F)  f32      w1_ref: (F, H)  bf16     b1_ref: (1, H)  f32
    # w2_ref: (1, H)   bf16     b2_ref: (1,)    f32 (SMEM)
    # o_ref : (1, TM)  f32  -- batch on the lane axis (lane-dense store)
    x = x_ref[...]

    # Linear-1 (BatchNorm already folded into w1/b1) + ReLU. bf16 MXU, f32 accumulate.
    h = jnp.dot(x.astype(jnp.bfloat16), w1_ref[...],
                preferred_element_type=jnp.float32) + b1_ref[...]
    h = jnp.maximum(h, 0.0)                                     # (TM, H) f32

    # Linear-2 (H -> 1) as a contraction over H that directly yields a lane-major row:
    #   z[0, m] = sum_k w2[0, k] * h[m, k]        -> (1, TM)
    z = jax.lax.dot_general(
        w2_ref[...], h.astype(jnp.bfloat16),
        dimension_numbers=(((1,), (1,)), ((), ())),
        preferred_element_type=jnp.float32)                     # (1, TM)

    o_ref[...] = jax.nn.sigmoid(z + b2_ref[0])


def fc_neuralnet_forward(x, params, *, block_rows=128):
    """x: (N, F) float32. params: gamma, beta, w1 (F,H), b1 (H,), w2 (H,1), b2 (1,)."""
    n, f = x.shape
    hidden = params["w1"].shape[1]
    x = x.astype(jnp.float32)

    # --- BatchNorm1d training-mode statistics over the FULL (unpadded) batch ---
    mean = jnp.mean(x, axis=0)
    var = jnp.mean(jnp.square(x - mean), axis=0)                # biased variance
    scale = params["gamma"] * jax.lax.rsqrt(var + EPS)          # (F,)
    shift = params["beta"] - mean * scale                       # (F,)

    # --- Fold the BN affine + normalization into Linear-1 (wrapper-side, once) ---
    w1_eff = (scale[:, None] * params["w1"]).astype(jnp.bfloat16)        # (F, H)
    b1_eff = (params["b1"] + shift @ params["w1"]).reshape(1, hidden)    # (1, H) f32
    w2_row = params["w2"].reshape(1, hidden).astype(jnp.bfloat16)        # (1, H)
    b2 = params["b2"].reshape(1).astype(jnp.float32)                     # (1,) scalar

    # --- Batch tiling: TM rows per grid step, TM a multiple of 128 (lane axis of out) ---
    tm = max(128, (block_rows // 128) * 128)
    n_pad = pl.cdiv(n, tm) * tm
    if n_pad != n:
        # Padded rows only produce garbage in the discarded tail of the (1, N) row;
        # BN statistics were computed before padding, so semantics are unaffected.
        x = jnp.pad(x, ((0, n_pad - n), (0, 0)))
    grid = (n_pad // tm,)

    out_row = pl.pallas_call(
        fc_net_kernel,
        out_shape=jax.ShapeDtypeStruct((1, n_pad), jnp.float32),
        grid_spec=pltpu.PrefetchScalarGridSpec(
            num_scalar_prefetch=0,
            grid=grid,
            in_specs=[
                pl.BlockSpec((tm, f), lambda i: (i, 0)),             # x rows (tiled)
                pl.BlockSpec((f, hidden), lambda i: (0, 0)),         # w1_eff (resident)
                pl.BlockSpec((1, hidden), lambda i: (0, 0)),         # b1_eff
                pl.BlockSpec((1, hidden), lambda i: (0, 0)),         # w2_row
                pl.BlockSpec(memory_space=pltpu.MemorySpace.SMEM),   # b2 scalar in SMEM
            ],
            out_specs=pl.BlockSpec((1, tm), lambda i: (0, i)),       # lane-dense output
        ),
        compiler_params=pltpu.CompilerParams(
            dimension_semantics=("parallel",),        # shard batch tiles across cores
            vmem_limit_bytes=32 * 1024 * 1024,        # safe on v5e/v6e/v7x at this tile
        ),
    )(x, w1_eff, b1_eff, w2_row, b2)

    return out_row[0, :n].reshape(n, 1)


def init_params(key, input_size, hidden_dim):
    """Synthetic params matching PyTorch layer shapes; Linear weights pre-transposed (in,out)."""
    k1, k2, k3, k4 = jax.random.split(key, 4)
    bound1 = 1.0 / (input_size ** 0.5)
    bound2 = 1.0 / (hidden_dim ** 0.5)
    return {
        "gamma": jnp.ones((input_size,), jnp.float32),   # BatchNorm1d weight
        "beta": jnp.zeros((input_size,), jnp.float32),   # BatchNorm1d bias
        "w1": jax.random.uniform(k1, (input_size, hidden_dim), jnp.float32, -bound1, bound1),
        "b1": jax.random.uniform(k2, (hidden_dim,), jnp.float32, -bound1, bound1),
        "w2": jax.random.uniform(k3, (hidden_dim, 1), jnp.float32, -bound2, bound2),
        "b2": jax.random.uniform(k4, (1,), jnp.float32, -bound2, bound2),
    }


def _reference(x, p):
    """Pure-f32 reference of BatchNorm1d(train) -> Linear -> ReLU -> Linear -> Sigmoid."""
    mean = jnp.mean(x, axis=0, keepdims=True)
    var = jnp.mean((x - mean) ** 2, axis=0, keepdims=True)
    y = (x - mean) / jnp.sqrt(var + EPS) * p["gamma"] + p["beta"]
    h = jnp.maximum(y @ p["w1"] + p["b1"], 0.0)
    return jax.nn.sigmoid(h @ p["w2"] + p["b2"])


if __name__ == "__main__":
    key = jax.random.PRNGKey(0)
    k_x, k_p = jax.random.split(key)

    # Small shapes; batch deliberately not a multiple of 128 to exercise padding + grid.
    batch, input_size, hidden_dim = 200, 16, 32
    x = jax.random.normal(k_x, (batch, input_size), jnp.float32)
    params = init_params(k_p, input_size, hidden_dim)

    out = fc_neuralnet_forward(x, params)
    out = jax.block_until_ready(out)

    ref = _reference(x, params)
    assert out.shape == (batch, 1)
    # Matmul operands are bf16 (f32 accumulate) -> relaxed tolerance vs f32 reference.
    assert jnp.allclose(out, ref, atol=1e-2, rtol=1e-2), float(jnp.max(jnp.abs(out - ref)))

    print("KERNEL_OK")
</pallas_src>

<mosaic_0001>
module attributes {stable_mosaic.version = 11 : i64} {
  func.func @fc_net_kernel(%arg0: i32, %arg1: memref<128x16xf32, #tpu.memory_space<vmem>>, %arg2: memref<16x32xbf16, #tpu.memory_space<vmem>>, %arg3: memref<1x32xf32, #tpu.memory_space<vmem>>, %arg4: memref<1x32xbf16, #tpu.memory_space<vmem>>, %arg5: memref<1xf32, #tpu.memory_space<smem>>, %arg6: memref<1x128xf32, #tpu.memory_space<vmem>>) attributes {dimension_semantics = [#tpu.dimension_semantics<parallel>], iteration_bounds = array<i64: 2>, scalar_prefetch = 0 : i64, scratch_operands = 0 : i64, tpu.core_type = #tpu.core_type<tc>, window_params = [{transform_indices = @transform_0, window_bounds = array<i64: 128, 16>}, {pipeline_mode = #tpu.pipeline_mode<synchronous>, transform_indices = @transform_1, window_bounds = array<i64: 16, 32>}, {pipeline_mode = #tpu.pipeline_mode<synchronous>, transform_indices = @transform_2, window_bounds = array<i64: 1, 32>}, {pipeline_mode = #tpu.pipeline_mode<synchronous>, transform_indices = @transform_3, window_bounds = array<i64: 1, 32>}, {transform_indices = @transform_4, window_bounds = array<i64: 1>}, {transform_indices = @transform_5, window_bounds = array<i64: 1, 128>}]} {
    %c0 = arith.constant 0 : index
    %c0_0 = arith.constant 0 : index
    %0 = vector.load %arg1[%c0, %c0_0] : memref<128x16xf32, #tpu.memory_space<vmem>>, vector<128x16xf32>
    %1 = arith.truncf %0 : vector<128x16xf32> to vector<128x16xbf16>
    %c0_1 = arith.constant 0 : index
    %c0_2 = arith.constant 0 : index
    %2 = vector.load %arg2[%c0_1, %c0_2] : memref<16x32xbf16, #tpu.memory_space<vmem>>, vector<16x32xbf16>
    %cst = arith.constant dense<0.000000e+00> : vector<128x32xf32>
    %3 = tpu.matmul %1, %2, %cst {dimension_numbers = #tpu.dot_dimension_numbers<[1], [0], [0], [1], [0, 0, 1, 1], [], []>} : vector<128x16xbf16>, vector<16x32xbf16>, vector<128x32xf32> -> vector<128x32xf32>
    %c0_3 = arith.constant 0 : index
    %c0_4 = arith.constant 0 : index
    %4 = vector.load %arg3[%c0_3, %c0_4] : memref<1x32xf32, #tpu.memory_space<vmem>>, vector<1x32xf32>
    %5 = vector.broadcast %4 : vector<1x32xf32> to vector<128x32xf32>
    %6 = arith.addf %3, %5 : vector<128x32xf32>
    %cst_5 = arith.constant 0.000000e+00 : f32
    %7 = vector.broadcast %cst_5 : f32 to vector<128x32xf32>
    %8 = arith.maximumf %6, %7 : vector<128x32xf32>
    %c0_6 = arith.constant 0 : index
    %c0_7 = arith.constant 0 : index
    %9 = vector.load %arg4[%c0_6, %c0_7] : memref<1x32xbf16, #tpu.memory_space<vmem>>, vector<1x32xbf16>
    %10 = arith.truncf %8 : vector<128x32xf32> to vector<128x32xbf16>
    %cst_8 = arith.constant dense<0.000000e+00> : vector<1x128xf32>
    %11 = tpu.matmul %9, %10, %cst_8 {dimension_numbers = #tpu.dot_dimension_numbers<[1], [1], [0], [0], [0, 0, 1, 0], [], []>} : vector<1x32xbf16>, vector<128x32xbf16>, vector<1x128xf32> -> vector<1x128xf32>
    %c0_9 = arith.constant 0 : index
    %12 = memref.load %arg5[%c0_9] : memref<1xf32, #tpu.memory_space<smem>>
    %13 = vector.broadcast %12 : f32 to vector<1x128xf32>
    %14 = arith.addf %11, %13 : vector<1x128xf32>
    %15 = arith.negf %14 : vector<1x128xf32>
    %16 = math.exp %15 : vector<1x128xf32>
    %cst_10 = arith.constant 1.000000e+00 : f32
    %17 = vector.broadcast %cst_10 : f32 to vector<1x128xf32>
    %18 = arith.addf %17, %16 : vector<1x128xf32>
    %19 = arith.divf %17, %18 : vector<1x128xf32>
    %c0_11 = arith.constant 0 : index
    %c0_12 = arith.constant 0 : index
    %20 = vector.load %arg6[%c0_11, %c0_12] : memref<1x128xf32, #tpu.memory_space<vmem>>, vector<1x128xf32>
    tpu.vector_store %arg6[%c0_11, %c0_12], %19 {strides = array<i32>} : memref<1x128xf32, #tpu.memory_space<vmem>>, vector<1x128xf32>,
    return
  }
  func.func @transform_0(%arg0: i32) -> (i32, i32) {
    %c0_i32 = arith.constant 0 : i32
    %c0_i32_0 = arith.constant 0 : i32
    return %arg0, %c0_i32 : i32, i32
  }
  func.func @transform_1(%arg0: i32) -> (i32, i32) {
    %c0_i32 = arith.constant 0 : i32
    %c0_i32_0 = arith.constant 0 : i32
    %c0_i32_1 = arith.constant 0 : i32
    return %c0_i32, %c0_i32_0 : i32, i32
  }
  func.func @transform_2(%arg0: i32) -> (i32, i32) {
    %c0_i32 = arith.constant 0 : i32
    %c0_i32_0 = arith.constant 0 : i32
    %c0_i32_1 = arith.constant 0 : i32
    return %c0_i32, %c0_i32_0 : i32, i32
  }
  func.func @transform_3(%arg0: i32) -> (i32, i32) {
    %c0_i32 = arith.constant 0 : i32
    %c0_i32_0 = arith.constant 0 : i32
    %c0_i32_1 = arith.constant 0 : i32
    return %c0_i32, %c0_i32_0 : i32, i32
  }
  func.func @transform_4(%arg0: i32) -> i32 {
    %c0_i32 = arith.constant 0 : i32
    %c0_i32_0 = arith.constant 0 : i32
    return %c0_i32 : i32
  }
  func.func @transform_5(%arg0: i32) -> (i32, i32) {
    %c0_i32 = arith.constant 0 : i32
    %c0_i32_0 = arith.constant 0 : i32
    return %c0_i32, %arg0 : i32, i32
  }
}

</mosaic_0001>

<bundles_post_ra>
// kernel: tpu_custom_call.1
= control target key start
LH: loop header
LB: loop body
LE: loop exit
PB: predicated region body
PF: predicated region fallthrough
CT: control target
= control target key end

     0   :  { %s767_s0 = inlined_call_operand.vmem [shape: f32[256,16], index: 0, kind: input, shape index: {}]   ;;  %s768_s1 = inlined_call_operand.vmem [shape: bf16[16,32], index: 1, kind: input, shape index: {}]   ;;  %s769_s2 = inlined_call_operand.vmem [shape: f32[1,32], index: 2, kind: input, shape index: {}]   ;;  %s770_s3 = inlined_call_operand.vmem [shape: bf16[1,32], index: 3, kind: input, shape index: {}]   ;;  %s771_s4 = inlined_call_operand.<no memory space> [shape: f32[1], index: 4, kind: input, shape index: {}]   ;;  %s772_s5 = inlined_call_operand.hbm [shape: f32[1,256], index: 5, kind: output, shape index: {}]  }
   0x1   :  { %10 = sst [smem:[#allocation2]] %s771_s4 }
   0x2   :  { %11 = vsyncpa [#allocation4], 0 }
   0x3   :  { %13 = vsyncpa [#allocation4 + $0x1], 0  ;;  %s657_s20 = smov 0   ;;  %s659_s21 = smov 0  }
   0x4   :  { %s661_s22 = smov 0   ;;  %s663_s23 = smov 0  }
   0x5 LB: > { %s678_s4 = sadd.s32 4294967295, %s622_s23   ;;  %s492_s24 = sadd.s32 4294967294, %s622_s23   ;;  %s622_s23 = sphi %s663_s23, %s778_s23   ;;  %s618_s22 = sphi %s661_s22, %s777_s22   ;;  %s614_s21 = sphi %s659_s21, %s776_s21   ;;  %s610_s20 = sphi %s657_s20, %s775_s20  }
   0x6   : > { %s682_s25 = sadd.s32 1, %s622_s23   ;;  %s136_s26 = sadd.s32 1, %s618_s22 }
   0x7   : > { %s133_s27 = ssub.s32 %s622_s23, %s682_s25  ;;  %p146_p0 = scmp.ne.s32.totalorder %s618_s22, %s614_s21 }
   0x8   : > { %p134_p1 = scmp.eq.s32.totalorder %s133_s27, 0  ;;  %p147_p2 = scmp.eq.s32.totalorder %s678_s4, 1 }
   0x9   : > { %p152_p3 = scmp.ne.s32.totalorder %s614_s21, %s610_s20  ;;  %p153_p4 = scmp.eq.s32.totalorder %s492_s24, 1 }
   0xa   : > { %s693_s28 = scalar_select %p134_p1, %s618_s22, %s136_s26  }
   0xb   : > { %p695_p5 = por %p147_p2, %p146_p0  ;;  %p699_p6 = por %p153_p4, %p152_p3 }
   0xc   : > { %p495_p7 = scmp.ge.s32.totalorder %s622_s23, 1  ;;  %p192_p8 = scmp.lt.s32.totalorder %s622_s23, 3 }
   0xe   : > { %p193_p9 = pnand %p495_p7, %p192_p8 }
   0xf   : > { %s496_s8 = sshll.u32 (!%p193_p9), %s678_s4, 4  ;;  %s361_s17 = sld [smem:[#allocation2]] (!%p193_p9) }
  0x10   : > { %196 = sbr.rel (%p193_p9) target bundleno = 444 (0x1bc), region = 40  ;;  %p220_p10 = scmp.lt.s32.totalorder (!%p193_p9), %s496_s8, 31 }
  0x11   : > { %s217_s18 = sand.u32 (!%p193_p9), 1, %s614_s21   ;;  %s433_s26 = scalar_lea.hbm (!%p193_p9), %s772_s5, %s678_s4 }
  0x12   : > { %s218_s27 = scalar_lea.vmem (!%p193_p9), [#allocation3], %s217_s18  ;;  %s437_s7 = sshll.u32 (!%p193_p9), %s433_s26, 4  ;;  %s438_s7 = int_to_ptr.hbm [resolvable:$true] %s437_s7 }
  0x13   : > { %s435_s6 = sshll.u32 (!%p193_p9), %s218_s27, 4  ;;  %s574_s4 = sshra.s32 (!%p193_p9), %s438_s7, 4  ;;  %s436_s6 = int_to_ptr.vmem [resolvable:$true] %s435_s6  ;;  %s575_s4 = int_to_ptr.hbm [resolvable:$true] %s574_s4 }
  0x14   : > { %p581_p0 = scmp.lt.s32.totalorder (!%p193_p9), %s575_s4, %s772_s5 }
  0x15   : > { %v514_v0 = vld [vmem:[%s768_s1] sm:$0xff]  ;;  %s780_s8 = smov (!%p220_p10, %s496_s8), 31  ;;  %vm262_vm0 = vcmask 130048   ;;  %vm363_vm1 = vcmask 261120  }
  0x16   : > { %515 = vmatpush.bf16.msra.mxu2 %v514_v0  ;;  %294 = vmatpush.bf16.msra.mxu0 %v514_v0  ;;  %s497_s9 = sshll.u32 %s780_s8, 3  ;;  %v555_v26 = vld [vmem:[%s769_s2] ss:$0 sm:$0xff]  ;;  %s425_s8 = scalar_lea.sflag [#allocation4], %s217_s18 }
  0x17   : > { %s223_s12 = scalar_lea.vmem %s767_s0, %s497_s9  ;;  %s576_s9 = scalar_lea.hbm %s575_s4, 1 }
  0x18   : > { %v234_v1 = vld [vmem:[%s223_s12 + $0x40] sm:$0xff]  ;;  %v235_v2 = vld [vmem:[%s223_s12 + $0x48] sm:$0xff]  ;;  %v236_v7 = vld [vmem:[%s223_s12 + $0x50] sm:$0xff]  ;;  %p577_p11 = scmp.ne.s32.totalorder %s575_s4, %s576_s9 }
  0x19   : > { %v246_v3 = vpack.c.bf16 %v235_v2, %v234_v1  ;;  %v226_v4 = vld [vmem:[%s223_s12] sm:$0xff]  ;;  %v227_v5 = vld [vmem:[%s223_s12 + $0x8] sm:$0xff]  ;;  %v237_v8 = vld [vmem:[%s223_s12 + $0x58] sm:$0xff] }
  0x1a   : > { %v242_v6 = vpack.c.bf16 %v227_v5, %v226_v4  ;;  %v228_v9 = vld [vmem:[%s223_s12 + $0x10] sm:$0xff]  ;;  %v229_v10 = vld [vmem:[%s223_s12 + $0x18] sm:$0xff]  ;;  %v247_v11 = vpack.c.bf16 %v237_v8, %v236_v7  ;;  %v238_v13 = vld [vmem:[%s223_s12 + $0x60] sm:$0xff]  ;;  %p578_p12 = pnand %p577_p11, %p695_p5 }
  0x1b   : > { %506 = vmatmul.msk.bf16.vlgmr.msra.gmra.mxu2 %vm262_vm0, %v246_v3  ;;  %v243_v12 = vpack.c.bf16 %v229_v10, %v228_v9  ;;  %v239_v14 = vld [vmem:[%s223_s12 + $0x68] sm:$0xff]  ;;  %v230_v15 = vld [vmem:[%s223_s12 + $0x20] sm:$0xff]  ;;  %v240_v19 = vld [vmem:[%s223_s12 + $0x70] sm:$0xff] }
  0x1c   : > { %502 = vmatmul.msk.bf16.vlgmr.msra.gmra.mxu0 %vm262_vm0, %v242_v6  ;;  %v231_v16 = vld [vmem:[%s223_s12 + $0x28] sm:$0xff]  ;;  %v248_v17 = vpack.c.bf16 %v239_v14, %v238_v13  ;;  %v241_v20 = vld [vmem:[%s223_s12 + $0x78] sm:$0xff]  ;;  %v232_v21 = vld [vmem:[%s223_s12 + $0x30] sm:$0xff]  ;;  %p579_p13 = pneg %p578_p12 }
  0x1d   : > { %v244_v18 = vpack.c.bf16 %v231_v16, %v230_v15  ;;  %v233_v22 = vld [vmem:[%s223_s12 + $0x38] sm:$0xff]  ;;  %v249_v23 = vpack.c.bf16 %v241_v20, %v240_v19  ;;  %s580_s12 = scalar_lea.hbm %s772_s5, 2 }
  0x1e   : > { %v245_v24 = vpack.c.bf16 %v233_v22, %v232_v21  ;;  %p582_p1 = scmp.lt.s32.totalorder %s580_s12, %s576_s9 }
  0x20   : > { %p583_p2 = por %p582_p1, %p581_p0 }
  0x22   : > { %p584_p3 = pnand %p583_p2, %p579_p13 }
  0x2b   : > { %507 = vmatmul.msk.bf16.gmra.mxu2 %vm262_vm0, %v247_v11 }
  0x2c   : > { %503 = vmatmul.msk.bf16.gmra.mxu0 %vm262_vm0, %v243_v12 }
  0x3b   : > { %508 = vmatmul.msk.bf16.gmra.mxu2 %vm262_vm0, %v248_v17 }
  0x3c   : > { %504 = vmatmul.msk.bf16.gmra.mxu0 %vm262_vm0, %v244_v18 }
  0x4b   : > { %509 = vmatmul.msk.bf16.gmra.mxu2 %vm262_vm0, %v249_v23 }
  0x4c   : > { %505 = vmatmul.msk.bf16.gmra.mxu0 %vm262_vm0, %v245_v24 }
  0x99   : > { %v296_v25 = vpop.f32.mrf.mxu0 }
  0x9a   : > { %v297_v28 = vadd.f32 %v555_v26, %v296_v25 }
  0x9c   : > { %v336_v30 = vmax.f32 %v297_v28, 0.0 }
  0x9e   : > { %v316_v27 = vpop.f32.mrf.mxu2 }
  0x9f   : > { %v317_v33 = vadd.f32 %v555_v26, %v316_v27  ;;  %v352_v27 = vld [vmem:[%s770_s3] sm:$0x1] }
  0xa1   : > { %v298_v29 = vpop.f32.mrf.mxu0  ;;  %v344_v37 = vmax.f32 %v317_v33, 0.0 }
  0xa2   : > { %v299_v31 = vadd.f32 %v555_v26, %v298_v29 }
  0xa4   : > { %v337_v32 = vmax.f32 %v299_v31, 0.0 }
  0xa6   : > { %v318_v34 = vpop.f32.mrf.mxu2  ;;  %v353_v35 = vpack.c.bf16 %v337_v32, %v336_v30 }
  0xa7   : > { %v319_v36 = vadd.f32 %v555_v26, %v318_v34 }
  0xa8   : > { %v368_v25 = vsel %vm363_vm1, %v353_v35, 0 }
  0xa9   : > { %v345_v38 = vmax.f32 %v319_v36, 0.0  ;;  %v301_v42 = vpop.f32.mrf.mxu0 }
  0xaa   : > { %v302_v17 = vadd.f32 %v555_v26, %v301_v42 }
  0xab   : > { %v357_v39 = vpack.c.bf16 %v345_v38, %v344_v37 }
  0xac   : > { %v338_v20 = vmax.f32 %v302_v17, 0.0 }
  0xad   : > { %v380_v10 = vsel %vm363_vm1, %v357_v39, 0 }
  0xae   : > { %v321_v40 = vpop.f32.mrf.mxu2 }
  0xaf   : > { %v322_v62 = vadd.f32 %v555_v26, %v321_v40 }
  0xb1   : > { %v303_v45 = vpop.f32.mrf.mxu0  ;;  %v346_v2 = vmax.f32 %v322_v62, 0.0 }
  0xb2   : > { %v304_v18 = vadd.f32 %v555_v26, %v303_v45 }
  0xb4   : > { %v339_v21 = vmax.f32 %v304_v18, 0.0 }
  0xb6   : > { %v323_v41 = vpop.f32.mrf.mxu2  ;;  %v354_v23 = vpack.c.bf16 %v339_v21, %v338_v20 }
  0xb7   : > { %v324_v60 = vadd.f32 %v555_v26, %v323_v41 }
  0xb8   : > { %v371_v24 = vsel %vm363_vm1, %v354_v23, 0 }
  0xb9   : > { %v306_v47 = vpop.f32.mrf.mxu0  ;;  %v347_v0 = vmax.f32 %v324_v60, 0.0 }
  0xba   : > { %v307_v11 = vadd.f32 %v555_v26, %v306_v47 }
  0xbb   : > { %v358_v3 = vpack.c.bf16 %v347_v0, %v346_v2 }
  0xbc   : > { %v340_v14 = vmax.f32 %v307_v11, 0.0 }
  0xbd   : > { %v383_v4 = vsel %vm363_vm1, %v358_v3, 0 }
  0xbe   : > { %v326_v43 = vpop.f32.mrf.mxu2 }
  0xbf   : > { %v327_v55 = vadd.f32 %v555_v26, %v326_v43 }
  0xc1   : > { %v308_v54 = vpop.f32.mrf.mxu0  ;;  %v348_v59 = vmax.f32 %v327_v55, 0.0 }
  0xc2   : > { %v309_v12 = vadd.f32 %v555_v26, %v308_v54 }
  0xc4   : > { %v341_v15 = vmax.f32 %v309_v12, 0.0 }
  0xc6   : > { %v328_v44 = vpop.f32.mrf.mxu2  ;;  %v355_v19 = vpack.c.bf16 %v341_v15, %v340_v14 }
  0xc7   : > { %v329_v51 = vadd.f32 %v555_v26, %v328_v44 }
  0xc8   : > { %v374_v22 = vsel %vm363_vm1, %v355_v19, 0 }
  0xc9   : > { %v349_v57 = vmax.f32 %v329_v51, 0.0  ;;  %v311_v63 = vpop.f32.mrf.mxu0 }
  0xca   : > { %v312_v6 = vadd.f32 %v555_v26, %v311_v63 }
  0xcb   : > { %v359_v61 = vpack.c.bf16 %v349_v57, %v348_v59 }
  0xcc   : > { %v342_v8 = vmax.f32 %v312_v6, 0.0 }
  0xcd   : > { %v386_v1 = vsel %vm363_vm1, %v359_v61, 0 }
  0xce   : > { %v331_v46 = vpop.f32.mrf.mxu2 }
  0xcf   : > { %v332_v48 = vadd.f32 %v555_v26, %v331_v46 }
  0xd1   : > { %v350_v52 = vmax.f32 %v332_v48, 0.0  ;;  %v313_v5 = vpop.f32.mrf.mxu0 }
  0xd2   : > { %v314_v7 = vadd.f32 %v555_v26, %v313_v5 }
  0xd4   : > { %v343_v9 = vmax.f32 %v314_v7, 0.0 }
  0xd6   : > { %v333_v49 = vpop.f32.mrf.mxu2  ;;  %v356_v13 = vpack.c.bf16 %v343_v9, %v342_v8 }
  0xd7   : > { %v334_v50 = vadd.f32 %v555_v26, %v333_v49  ;;  %v362_v26 = vstv %s361_s17 }
  0xd8   : > { %v377_v16 = vsel %vm363_vm1, %v356_v13, 0 }
  0xd9   : > { %v351_v53 = vmax.f32 %v334_v50, 0.0 }
  0xdb   : > { %v360_v56 = vpack.c.bf16 %v351_v53, %v350_v52 }
  0xdd   : > { %v389_v58 = vsel %vm363_vm1, %v360_v56, 0 }
  0xde   : > { %391 = vmatpush.bf16.xpose.msra.mxu1 %v389_v58 }
  0xe6   : > { %392 = vmatpush.bf16.xpose.msra.mxu1 %v386_v1 }
  0xee   : > { %393 = vmatpush.bf16.xpose.msra.mxu1 %v383_v4 }
  0xf6   : > { %394 = vmatpush.bf16.xpose.msra.mxu1 %v380_v10 }
  0xfe   : > { %395 = vmatpush.bf16.xpose.msra.mxu1 %v377_v16 }
 0x106   : > { %396 = vmatpush.bf16.xpose.msra.mxu1 %v374_v22 }
 0x10e   : > { %397 = vmatpush.bf16.xpose.msra.mxu1 %v371_v24 }
 0x116   : > { %398 = vmatpush.bf16.xpose.msra.mxu1 %v368_v25 }
 0x11d   : > { %510 = vmatmul.msk.bf16.vlgmr.msra.gmra.mxu1 %vm363_vm1, %v352_v27 }
 0x19a   : > { %v400_v28 = vpop.f32.mrf.mxu1 }
 0x19b   : > { %v401_v29 = vadd.f32 %v400_v28, %v362_v26 }
 0x19d   : > { %v511_v30 = vmul.f32 -1.442695, %v401_v29 }
 0x19f   : > { %556 = vpow2.f32 %v511_v30 }
 0x1a2   : > { %v402_v31 = vpop.f32.mrf.mxu1 }
 0x1a5   : > { %v557_v32 = vpop.eup %556 }
 0x1a6   : > { %v407_v33 = vadd.f32 1.0, %v557_v32 }
 0x1a8   : > { %558 = vrcp.f32 %v407_v33  ;;  %v419_v37 = vand.u32 2147483648, %v407_v33  ;;  %v417_v39 = vand.u32 2147483647, %v407_v33  ;;  %vm413_vm3 = vweird.f32 %v407_v33 }
 0x1aa   : > { %v420_v41 = vor.u32 1.1754944e-38, %v419_v37  ;;  %vm418_vm5 = vcmp.eq.f32.partialorder %v417_v39, 8.507059e+37 }
 0x1ae   : > { %v559_v34 = vpop.eup %558 }
 0x1af   : > { %v409_v35 = vmul.f32 %v559_v34, %v407_v33  ;;  %vm414_vm2 = vweird.f32 %v559_v34 }
 0x1b0   : > { %vm415_vm4 = vmor %vm413_vm3, %vm414_vm2 }
 0x1b1   : > { %v410_v36 = vsub.f32 1.0, %v409_v35 }
 0x1b3   : > { %v411_v38 = vmul.f32 %v559_v34, %v410_v36 }
 0x1b5   : > { %v412_v40 = vadd.f32 %v559_v34, %v411_v38 }
 0x1b7   : > { %v416_v42 = vsel %vm415_vm4, %v559_v34, %v412_v40 }
 0x1b8   : > { %v421_v43 = vsel %vm418_vm5, %v420_v41, %v416_v42 }
 0x1b9   : > { %423 = vst [vmem:[%s218_s27] sm:$0x1] %v421_v43 }
 0x1ba   : > { %587 = shalt.err (!%p584_p3)
}
 0x1bb   : > { %516 = dma.vmem_to_hbm [thread:$0]  (%p695_p5), %s436_s6, 16, %s438_s7, %s425_s8  }
 0x1bc PF: > { %p522_p4 = scmp.ge.s32.totalorder %s622_s23, 2  ;;  %s449_s15 = sand.u32 1, %s610_s20  }
 0x1bd   : > { %s450_s16 = scalar_lea.sflag [#allocation4], %s449_s15 }
 0x1be   : > { %p519_p7 = pnand %p522_p4, %p699_p6 }
 0x1c0   : > { %p520_p8 = pneg %p519_p7 }
 0x1c2   : > { %605 = dma.done.wait (%p520_p8), %s450_s16, 16  }
 0x1c3   : > { %607 = vsyncadd (%p520_p8), %s450_s16, 4294967280  ;;  %p16_p9 = scmp.ge.s32.totalorder %s682_s25, 4   ;;  %s775_s20 = smov %s614_s21 }
 0x1c4   : > { %s776_s21 = smov %s618_s22  ;;  %s777_s22 = smov %s693_s28 }
 0x1c5   : > { %s778_s23 = smov %s682_s25  ;;  %18 = sbr.rel (!%p16_p9) target bundleno = 5 (0x5), region = 75 }
 0x1ca   :  { %455 = vsyncpa [#allocation4], 1 }
 0x1cb   :  { %457 = vsyncpa [#allocation4 + $0x1], 1 }

</bundles_post_ra>
